<compile_context>
chip_gen: v6e
topology: v6e:2x2x1
jax: 0.10.0
libtpu: 0.0.40
codegen_flags: <defaults>
</compile_context>

<pallas_src>
import functools

import jax
import jax.numpy as jnp
from jax.experimental import pallas as pl
from jax.experimental.pallas import tpu as pltpu

LANES = 128
ROW_ALIGN = 16          # multiple of both the f32 (8,128) and bf16 (16,128) tiles
MAX_TILE_ROWS = 2048    # (2048,128) f32 = 1 MiB/stream; 2 streams x 2 bufs = 4 MiB VMEM
NCORES = 2              # leading "parallel" grid axis (v7x megacore; harmless on 1-TC chips)
NEG_LARGE = -1e30       # sigmoid(NEG_LARGE) == 0  -> padded tail contributes nothing


def _dice_partial_kernel(o_ref, t_ref, acc_ref):
    """Accumulates per-lane partial sums into the resident output block.

    o_ref: (TILE_ROWS, 128) logits tile.
    t_ref: (TILE_ROWS, 128) target tile.
    acc_ref: (1, 3, ROW_ALIGN, 128) f32 output block, resident across the inner
             ("arbitrary") grid axis for this core:
               acc[0,0] -> partials of sum(sigmoid(o)*t)
               acc[0,1] -> partials of sum(sigmoid(o))
               acc[0,2] -> partials of sum(t)
    """
    @pl.when(pl.program_id(1) == 0)
    def _():
        acc_ref[...] = jnp.zeros_like(acc_ref)

    p = jax.nn.sigmoid(o_ref[...].astype(jnp.float32))
    t = t_ref[...].astype(jnp.float32)

    # Row-group reduction only (cheap VPU adds over (ROW_ALIGN,128) vreg tiles);
    # the full cross-lane reduction is done once in the wrapper on a tiny array.
    shp = (-1, ROW_ALIGN, LANES)
    acc_ref[0, 0, :, :] += jnp.sum((p * t).reshape(shp), axis=0)
    acc_ref[0, 1, :, :] += jnp.sum(p.reshape(shp), axis=0)
    acc_ref[0, 2, :, :] += jnp.sum(t.reshape(shp), axis=0)


@functools.partial(jax.jit, static_argnames=("smooth", "eps"))
def dice_loss(output, target, smooth=0.0, eps=1e-07):
    assert output.shape == target.shape
    n = output.size

    # Keep floating dtypes as-is (bf16 stays bf16 in HBM); ints/bools -> f32.
    o_dtype = output.dtype if jnp.issubdtype(output.dtype, jnp.floating) else jnp.float32
    t_dtype = target.dtype if jnp.issubdtype(target.dtype, jnp.floating) else jnp.float32
    o_flat = output.reshape(-1).astype(o_dtype)
    t_flat = target.reshape(-1).astype(t_dtype)

    rows = pl.cdiv(n, LANES)
    tile_rows = min(MAX_TILE_ROWS, ROW_ALIGN * pl.cdiv(rows, ROW_ALIGN))
    chunk_rows = NCORES * tile_rows
    rows_padded = chunk_rows * pl.cdiv(rows, chunk_rows)
    pad = rows_padded * LANES - n

    # Mask-free padding: sigmoid(-1e30) == 0 and target pad == 0, so sum(p),
    # sum(t) and sum(p*t) are unaffected by the padded tail.
    o2 = jnp.pad(o_flat, (0, pad), constant_values=NEG_LARGE).reshape(rows_padded, LANES)
    t2 = jnp.pad(t_flat, (0, pad), constant_values=0).reshape(rows_padded, LANES)

    tiles_per_core = rows_padded // (NCORES * tile_rows)
    in_spec = pl.BlockSpec((tile_rows, LANES),
                           lambda c, i: (c * tiles_per_core + i, 0))

    partials = pl.pallas_call(
        _dice_partial_kernel,
        out_shape=jax.ShapeDtypeStruct((NCORES, 3, ROW_ALIGN, LANES), jnp.float32),
        grid_spec=pltpu.PrefetchScalarGridSpec(
            num_scalar_prefetch=0,
            grid=(NCORES, tiles_per_core),
            in_specs=[in_spec, in_spec],
            out_specs=pl.BlockSpec((1, 3, ROW_ALIGN, LANES),
                                   lambda c, i: (c, 0, 0, 0)),
        ),
        compiler_params=pltpu.CompilerParams(
            dimension_semantics=("parallel", "arbitrary"),
            vmem_limit_bytes=32 << 20),
    )(o2, t2)

    # Tiny final reduction (NCORES*3*ROW_ALIGN*128 floats) + scalar combine.
    sums = jnp.sum(partials, axis=(0, 2, 3))
    sum_pt, sum_p, sum_t = sums[0], sums[1], sums[2]
    return 1.0 - (2.0 * sum_pt + smooth) / (sum_p + sum_t + smooth + eps)


if __name__ == "__main__":
    key = jax.random.PRNGKey(0)
    k1, k2 = jax.random.split(key)

    # Same shapes a segmentation loss would see: NCHW logits + binary target.
    output = jax.random.normal(k1, (2, 4, 16, 16), dtype=jnp.float32)
    target = (jax.random.uniform(k2, (2, 4, 16, 16)) > 0.5).astype(jnp.float32)

    loss = dice_loss(output, target, smooth=0.0, eps=1e-07)
    jax.block_until_ready(loss)

    # Pure-JAX reference check of the same math.
    p = jax.nn.sigmoid(output)
    ref = 1.0 - (2.0 * jnp.sum(p * target)) / (jnp.sum(p) + jnp.sum(target) + 1e-07)
    assert jnp.allclose(loss, ref, atol=1e-5, rtol=1e-5), (loss, ref)

    print("KERNEL_OK")
</pallas_src>

<mosaic_0001>
module attributes {stable_mosaic.version = 11 : i64} {
  func.func @_dice_partial_kernel(%arg0: i32, %arg1: i32, %arg2: memref<16x128xf32, #tpu.memory_space<vmem>>, %arg3: memref<16x128xf32, #tpu.memory_space<vmem>>, %arg4: memref<1x3x16x128xf32, #tpu.memory_space<vmem>>) attributes {dimension_semantics = [#tpu.dimension_semantics<parallel>, #tpu.dimension_semantics<arbitrary>], iteration_bounds = array<i64: 2, 1>, scalar_prefetch = 0 : i64, scratch_operands = 0 : i64, tpu.core_type = #tpu.core_type<tc>, window_params = [{transform_indices = @transform_0, window_bounds = array<i64: 16, 128>}, {transform_indices = @transform_1, window_bounds = array<i64: 16, 128>}, {transform_indices = @transform_2, window_bounds = array<i64: 1, 3, 16, 128>}]} {
    %c0_i32 = arith.constant 0 : i32
    %0 = arith.cmpi eq, %arg1, %c0_i32 : i32
    %1 = arith.extui %0 : i1 to i32
    %c0_i32_0 = arith.constant 0 : i32
    %2 = arith.cmpi ne, %1, %c0_i32_0 : i32
    scf.if %2 {
      %cst_29 = arith.constant 0.000000e+00 : f32
      %35 = vector.broadcast %cst_29 : f32 to vector<1x3x16x128xf32>
      %c0_30 = arith.constant 0 : index
      %c0_31 = arith.constant 0 : index
      %c0_32 = arith.constant 0 : index
      %c0_33 = arith.constant 0 : index
      %36 = vector.load %arg4[%c0_30, %c0_31, %c0_32, %c0_33] : memref<1x3x16x128xf32, #tpu.memory_space<vmem>>, vector<1x3x16x128xf32>
      tpu.vector_store %arg4[%c0_30, %c0_31, %c0_32, %c0_33], %35 {strides = array<i32>} : memref<1x3x16x128xf32, #tpu.memory_space<vmem>>, vector<1x3x16x128xf32>,
    } else {
    }
    %c0 = arith.constant 0 : index
    %c0_1 = arith.constant 0 : index
    %3 = vector.load %arg2[%c0, %c0_1] : memref<16x128xf32, #tpu.memory_space<vmem>>, vector<16x128xf32>
    %4 = arith.negf %3 : vector<16x128xf32>
    %5 = math.exp %4 : vector<16x128xf32>
    %cst = arith.constant 1.000000e+00 : f32
    %6 = vector.broadcast %cst : f32 to vector<16x128xf32>
    %7 = arith.addf %6, %5 : vector<16x128xf32>
    %8 = arith.divf %6, %7 : vector<16x128xf32>
    %c0_2 = arith.constant 0 : index
    %c0_3 = arith.constant 0 : index
    %9 = vector.load %arg3[%c0_2, %c0_3] : memref<16x128xf32, #tpu.memory_space<vmem>>, vector<16x128xf32>
    %c0_4 = arith.constant 0 : index
    %c0_5 = arith.constant 0 : index
    %c0_6 = arith.constant 0 : index
    %c0_7 = arith.constant 0 : index
    %10 = vector.load %arg4[%c0_4, %c0_5, %c0_6, %c0_7] : memref<1x3x16x128xf32, #tpu.memory_space<vmem>>, vector<1x1x16x128xf32>
    %11 = vector.shape_cast %10 : vector<1x1x16x128xf32> to vector<16x128xf32>
    %12 = arith.mulf %8, %9 : vector<16x128xf32>
    %13 = vector.shape_cast %12 : vector<16x128xf32> to vector<1x16x128xf32>
    %cst_8 = arith.constant dense<0.000000e+00> : vector<16x128xf32>
    %14 = vector.multi_reduction <add>, %13, %cst_8 [0] : vector<1x16x128xf32> to vector<16x128xf32>
    %15 = arith.addf %11, %14 : vector<16x128xf32>
    %c0_9 = arith.constant 0 : index
    %c0_10 = arith.constant 0 : index
    %c0_11 = arith.constant 0 : index
    %c0_12 = arith.constant 0 : index
    %16 = vector.load %arg4[%c0_9, %c0_10, %c0_11, %c0_12] : memref<1x3x16x128xf32, #tpu.memory_space<vmem>>, vector<1x1x16x128xf32>
    %17 = vector.shape_cast %16 : vector<1x1x16x128xf32> to vector<16x128xf32>
    %18 = vector.shape_cast %15 : vector<16x128xf32> to vector<1x1x16x128xf32>
    tpu.vector_store %arg4[%c0_9, %c0_10, %c0_11, %c0_12], %18 {strides = array<i32>} : memref<1x3x16x128xf32, #tpu.memory_space<vmem>>, vector<1x1x16x128xf32>,
    %c0_13 = arith.constant 0 : index
    %c1 = arith.constant 1 : index
    %c0_14 = arith.constant 0 : index
    %c0_15 = arith.constant 0 : index
    %19 = vector.load %arg4[%c0_13, %c1, %c0_14, %c0_15] : memref<1x3x16x128xf32, #tpu.memory_space<vmem>>, vector<1x1x16x128xf32>
    %20 = vector.shape_cast %19 : vector<1x1x16x128xf32> to vector<16x128xf32>
    %21 = vector.shape_cast %8 : vector<16x128xf32> to vector<1x16x128xf32>
    %cst_16 = arith.constant dense<0.000000e+00> : vector<16x128xf32>
    %22 = vector.multi_reduction <add>, %21, %cst_16 [0] : vector<1x16x128xf32> to vector<16x128xf32>
    %23 = arith.addf %20, %22 : vector<16x128xf32>
    %c0_17 = arith.constant 0 : index
    %c1_18 = arith.constant 1 : index
    %c0_19 = arith.constant 0 : index
    %c0_20 = arith.constant 0 : index
    %24 = vector.load %arg4[%c0_17, %c1_18, %c0_19, %c0_20] : memref<1x3x16x128xf32, #tpu.memory_space<vmem>>, vector<1x1x16x128xf32>
    %25 = vector.shape_cast %24 : vector<1x1x16x128xf32> to vector<16x128xf32>
    %26 = vector.shape_cast %23 : vector<16x128xf32> to vector<1x1x16x128xf32>
    tpu.vector_store %arg4[%c0_17, %c1_18, %c0_19, %c0_20], %26 {strides = array<i32>} : memref<1x3x16x128xf32, #tpu.memory_space<vmem>>, vector<1x1x16x128xf32>,
    %c0_21 = arith.constant 0 : index
    %c2 = arith.constant 2 : index
    %c0_22 = arith.constant 0 : index
    %c0_23 = arith.constant 0 : index
    %27 = vector.load %arg4[%c0_21, %c2, %c0_22, %c0_23] : memref<1x3x16x128xf32, #tpu.memory_space<vmem>>, vector<1x1x16x128xf32>
    %28 = vector.shape_cast %27 : vector<1x1x16x128xf32> to vector<16x128xf32>
    %29 = vector.shape_cast %9 : vector<16x128xf32> to vector<1x16x128xf32>
    %cst_24 = arith.constant dense<0.000000e+00> : vector<16x128xf32>
    %30 = vector.multi_reduction <add>, %29, %cst_24 [0] : vector<1x16x128xf32> to vector<16x128xf32>
    %31 = arith.addf %28, %30 : vector<16x128xf32>
    %c0_25 = arith.constant 0 : index
    %c2_26 = arith.constant 2 : index
    %c0_27 = arith.constant 0 : index
    %c0_28 = arith.constant 0 : index
    %32 = vector.load %arg4[%c0_25, %c2_26, %c0_27, %c0_28] : memref<1x3x16x128xf32, #tpu.memory_space<vmem>>, vector<1x1x16x128xf32>
    %33 = vector.shape_cast %32 : vector<1x1x16x128xf32> to vector<16x128xf32>
    %34 = vector.shape_cast %31 : vector<16x128xf32> to vector<1x1x16x128xf32>
    tpu.vector_store %arg4[%c0_25, %c2_26, %c0_27, %c0_28], %34 {strides = array<i32>} : memref<1x3x16x128xf32, #tpu.memory_space<vmem>>, vector<1x1x16x128xf32>,
    return
  }
  func.func @transform_0(%arg0: i32, %arg1: i32) -> (i32, i32) {
    %c1_i32 = arith.constant 1 : i32
    %0 = arith.muli %arg0, %c1_i32 : i32
    %1 = arith.addi %0, %arg1 : i32
    %c0_i32 = arith.constant 0 : i32
    %c0_i32_0 = arith.constant 0 : i32
    return %1, %c0_i32 : i32, i32
  }
  func.func @transform_1(%arg0: i32, %arg1: i32) -> (i32, i32) {
    %c1_i32 = arith.constant 1 : i32
    %0 = arith.muli %arg0, %c1_i32 : i32
    %1 = arith.addi %0, %arg1 : i32
    %c0_i32 = arith.constant 0 : i32
    %c0_i32_0 = arith.constant 0 : i32
    return %1, %c0_i32 : i32, i32
  }
  func.func @transform_2(%arg0: i32, %arg1: i32) -> (i32, i32, i32, i32) {
    %c0_i32 = arith.constant 0 : i32
    %c0_i32_0 = arith.constant 0 : i32
    %c0_i32_1 = arith.constant 0 : i32
    %c0_i32_2 = arith.constant 0 : i32
    return %arg0, %c0_i32, %c0_i32_0, %c0_i32_1 : i32, i32, i32, i32
  }
}

</mosaic_0001>

<bundles_post_ra>
// kernel: dice_loss.1
= control target key start
LH: loop header
LB: loop body
LE: loop exit
PB: predicated region body
PF: predicated region fallthrough
CT: control target
= control target key end

     0   :  { %s418_s9 = smov 0   ;;  %s420_s10 = smov 0   ;;  %s454_s0 = inlined_call_operand.vmem [shape: f32[32,128], index: 0, kind: input, shape index: {}]   ;;  %s455_s1 = inlined_call_operand.vmem [shape: f32[32,128], index: 1, kind: input, shape index: {}]   ;;  %s456_s2 = inlined_call_operand.vmem [shape: f32[2,3,16,128], index: 2, kind: output, shape index: {}]  }
   0x1   :  { %s422_s11 = smov 0  }
   0x2 LB: > { %s24_s12 = sadd.s32 1, %s397_s10  ;;  %p327_p0 = scmp.ge.s32.totalorder %s401_s11, 1  ;;  %s401_s11 = sphi %s422_s11, %s12_s11   ;;  %s397_s10 = sphi %s420_s10, %s458_s10   ;;  %s393_s9 = sphi %s418_s9, %s457_s9  }
   0x3   : > { %p26_p1 = scmp.ge.s32.totalorder %s24_s12, 2  ;;  %p144_p2 = scmp.lt.s32.totalorder %s401_s11, 3 }
   0x5   : > { %s460_s12 = smov (%p26_p1, %s24_s12), 0  ;;  %p145_p3 = pnand %p327_p0, %p144_p2 }
   0x6   : > { %p189_p4 = scmp.lt.s32.totalorder (!%p145_p3), %s393_s9, 1  ;;  %s328_s13 = sshll.u32 (!%p145_p3), %s393_s9, 1 }
   0x7   : > { %148 = sbr.rel (%p145_p3) target bundleno = 52 (0x34), region = 28  ;;  %p175_p5 = scmp.lt.s32.totalorder (!%p145_p3), %s328_s13, 3 }
   0xc   : > { %s462_s9 = smov (!%p189_p4, %s393_s9), 1  ;;  %s464_s13 = smov (!%p175_p5, %s328_s13), 3 }
   0xd   : > { %s345_s14 = smul.u32 48, %s462_s9  ;;  %s329_s15 = sshll.u32 %s464_s13, 3 }
   0xe   : > { %s178_s18 = scalar_lea.vmem %s454_s0, %s329_s15  ;;  %s186_s21 = scalar_lea.vmem %s455_s1, %s329_s15 }
   0xf   : > { %v204_v0 = vld [vmem:[%s178_s18] sm:$0xff]  ;;  %v205_v1 = vld [vmem:[%s178_s18 + $0x8] sm:$0xff]  ;;  %s193_s24 = scalar_lea.vmem %s456_s2, %s345_s14 }
  0x10   : > { %v333_v2 = vmul.f32 -1.442695, %v204_v0  ;;  %v334_v3 = vmul.f32 -1.442695, %v205_v1  ;;  %v218_v4 = vld [vmem:[%s186_s21] sm:$0xff]  ;;  %v219_v5 = vld [vmem:[%s186_s21 + $0x8] sm:$0xff] }
  0x11   : > { %341 = vst [vmem:[%s193_s24 + $0x20] sm:$0xff] %v218_v4  ;;  %342 = vst [vmem:[%s193_s24 + $0x28] sm:$0xff] %v219_v5 }
  0x12   : > { %371 = vpow2.f32 %v333_v2 }
  0x13   : > { %373 = vpow2.f32 %v334_v3 }
  0x1f   : > { %v372_v6 = vpop.eup %371 }
  0x20   : > { %v374_v7 = vpop.eup %373  ;;  %v212_v8 = vadd.f32 1.0, %v372_v6 }
  0x21   : > { %v213_v9 = vadd.f32 1.0, %v374_v7 }
  0x22   : > { %375 = vrcp.f32 %v212_v8 }
  0x23   : > { %377 = vrcp.f32 %v213_v9 }
  0x2f   : > { %v376_v10 = vpop.eup %375 }
  0x30   : > { %v378_v11 = vpop.eup %377  ;;  %v222_v12 = vmul.f32 %v376_v10, %v218_v4  ;;  %337 = vst [vmem:[%s193_s24 + $0x10] sm:$0xff] %v376_v10 }
  0x31   : > { %v223_v13 = vmul.f32 %v378_v11, %v219_v5  ;;  %338 = vst [vmem:[%s193_s24 + $0x18] sm:$0xff] %v378_v11 }
  0x32   : > { %228 = vst [vmem:[%s193_s24] sm:$0xff] %v222_v12 }
  0x33   : > { %229 = vst [vmem:[%s193_s24 + $0x8] sm:$0xff] %v223_v13 }
  0x34 PF: > { %s12_s11 = sadd.s32 1, %s401_s11   ;;  %s457_s9 = smov %s397_s10 }
  0x35   : > { %p9_p6 = scmp.ge.s32.totalorder %s12_s11, 4   ;;  %s458_s10 = smov %s460_s12 }
  0x37   :  { %11 = sbr.rel (!%p9_p6) target bundleno = 2 (0x2), region = 67 }

</bundles_post_ra>
